<compile_context>
chip_gen: v5e
topology: v5e:2x2
jax: 0.10.0
libtpu: 0.0.40
codegen_flags: <defaults>
</compile_context>

<pallas_src>
import jax
import jax.numpy as jnp
from jax import lax
from jax.experimental import pallas as pl
from jax.experimental.pallas import tpu as pltpu

_SQRT_HALF = 0.7071067811865476


def _gelu(x, approximate=False):
    if approximate:
        # tanh approximation: transcendental lands on the EUP slot (co-issues
        # with VALU/MXU).  Slightly different numerics vs PyTorch's exact GELU,
        # so it is opt-in only.
        c = jnp.float32(0.7978845608028654)  # sqrt(2/pi)
        return 0.5 * x * (1.0 + jnp.tanh(c * (x + 0.044715 * x * x * x)))
    # PyTorch nn.GELU() default = exact erf formulation (kept for parity).
    return 0.5 * x * (1.0 + lax.erf(x * jnp.float32(_SQRT_HALF)))


def _tpu_vmem_capacity_bytes():
    try:
        return int(pltpu.get_tpu_info().vmem_capacity_bytes)
    except Exception:
        return 128 * 1024 * 1024  # v5e/v6e default; conservative fallback


def _est_vmem_bytes(bb, T, C, Ht, Hc, single_buffer_params):
    """Rough per-grid-step VMEM footprint (bytes)."""
    io = 2 * 4 * (bb * T * C        # x_slab block (double-buffered)
                  + bb * T * C      # x_rows block
                  + bb * T * C)     # out block
    w = 2 * (2 * Ht * T + 2 * C * Hc)          # bf16 weights, one copy
    w *= 1 if single_buffer_params else 2
    acts = 4 * bb * (Ht * C + T * Hc + 6 * T * C)   # f32 intermediates (h, u, y1, h2, ...)
    return io + w + acts + (2 << 20)


def _pick_block_b(B, T, C, Ht, Hc, vmem_budget, single_buffer_params):
    """Pick how many batch elements per grid step.

    Hard constraints (BlockSpec (8,128) rule):
      * (bb*T) % 8 == 0  or bb == B   (row block of x_rows / out)
      * (bb*C) % 128 == 0 or bb == B  (lane block of the (T, B*C) slab)
    Preferences: fit the VMEM budget, keep >= 2 grid steps (v7x: 2 TensorCores),
    then take the largest bb (amortizes per-step overhead, grows matmul M/N).
    """
    def ok(bb):
        if B % bb:
            return False
        rows_ok = (bb * T) % 8 == 0 or bb == B
        lanes_ok = (bb * C) % 128 == 0 or bb == B
        return rows_ok and lanes_ok

    valid = [bb for bb in range(1, B + 1) if ok(bb)]          # bb == B always valid
    fitting = [bb for bb in valid
               if _est_vmem_bytes(bb, T, C, Ht, Hc, single_buffer_params) <= vmem_budget]
    if not fitting:
        fitting = [min(valid)]
    multi = [bb for bb in fitting if (B // bb) >= 2]
    pool = multi if multi else fitting
    return max(pool)


def _const_spec(arr, single_buffer):
    """Whole-array block with constant index map (DMA'd once across the grid)."""
    nd = arr.ndim
    idx = lambda i, _nd=nd: (0,) * _nd
    if single_buffer:
        try:
            # Constant block index -> double buffering only burns VMEM.
            return pl.BlockSpec(arr.shape, idx, pipeline_mode=pl.Buffered(1))
        except TypeError:
            pass  # BlockSpec without pipeline_mode support: fall back
    return pl.BlockSpec(arr.shape, idx)


def tcm_block(x, params, *, block_b=None, vmem_limit_bytes=None,
              single_buffer_params=None, approximate_gelu=False):
    """x: (B, T, C) float32. params: dict of weights (see init_params)."""
    B, T, C = x.shape
    Ht = params["w1t"].shape[1]   # tokens hidden dim (= 4*T)
    Hc = params["w1c"].shape[1]   # channel hidden dim (= 4*C)

    bf16, f32 = jnp.bfloat16, jnp.float32

    # ---- generation-aware budgets ----
    cap = _tpu_vmem_capacity_bytes()
    if vmem_limit_bytes is None:
        # ~40 MiB on v7x (64 MiB/TC), ~80 MiB on v5e/v6e (128 MiB) - headroom
        # left for Mosaic internal scratch.
        vmem_limit_bytes = int(cap * 0.625)

    weight_bytes_2buf = 2 * 2 * (2 * Ht * T + 2 * C * Hc)     # bf16, double-buffered
    if single_buffer_params is None:
        single_buffer_params = weight_bytes_2buf > (4 << 20)

    if block_b is None:
        block_b = _pick_block_b(B, T, C, Ht, Hc,
                                vmem_budget=int(vmem_limit_bytes * 0.9),
                                single_buffer_params=single_buffer_params)
    bb = block_b
    assert B % bb == 0, "block_b must divide B"
    assert (bb * T) % 8 == 0 or bb == B, "row block must be sublane-aligned"
    assert (bb * C) % 128 == 0 or bb == B, "slab block must be lane-aligned"
    rows = bb * T

    # ---- layout / dtype prep (wrapper side, once per call) ----
    # Token-MLP weights pre-transposed (no in-kernel transpose); matmul weights
    # in bf16 (MXU-native); biases / affines / layer-scales stay f32.
    w1t_T = params["w1t"].T.astype(bf16)                    # (Ht, T)
    w2t_T = params["w2t"].T.astype(bf16)                    # (T, Ht)
    w1c = params["w1c"].astype(bf16)                        # (C, Hc)
    w2c = params["w2c"].astype(bf16)                        # (Hc, C)
    b1t_col = params["b1t"].reshape(Ht, 1).astype(f32)      # bias over rows of (Ht, bb*C)
    b2t_col = params["b2t"].reshape(T, 1).astype(f32)       # bias over rows of (T, bb*C)
    b1c = params["b1c"].reshape(1, Hc).astype(f32)
    b2c = params["b2c"].reshape(1, C).astype(f32)
    # Affine1 / layer-scale-1 tiled to the slab's (1, bb*C) column layout.
    a1s = jnp.tile(params["a1"].reshape(1, C).astype(f32), (1, bb))
    be1s = jnp.tile(params["be1"].reshape(1, C).astype(f32), (1, bb))
    ls1s = jnp.tile(params["ls1"].reshape(1, C).astype(f32), (1, bb))
    a2 = params["a2"].reshape(1, C).astype(f32)
    be2 = params["be2"].reshape(1, C).astype(f32)
    ls2 = params["ls2"].reshape(1, C).astype(f32)

    # Two layouts of x (wrapper-side, one extra XLA pass; the block is compute
    # bound so this is cheap and keeps all in-kernel repacking out of the MXU path):
    x_rows = x.reshape(B * T, C)                              # channel branch / residual
    x_slab = jnp.transpose(x, (1, 0, 2)).reshape(T, B * C)    # token branch (batch in lanes)

    def kernel(xs_ref, xr_ref,
               a1s_ref, be1s_ref,                             # affine1 (slab layout)
               w1tT_ref, b1t_ref, w2tT_ref, b2t_ref,          # linear_tokens (pre-T)
               ls1s_ref,                                      # layer-scale 1 (slab layout)
               a2_ref, be2_ref,                               # affine2
               w1c_ref, b1c_ref, w2c_ref, b2c_ref,            # mlp_channels
               ls2_ref,
               o_ref):
        # ---- token-mixing branch: x + ls1 * MLP_T(affine1(x).T).T ----
        # Batch is folded into the matmul N dimension: one (Ht,T)@(T,bb*C) and
        # one (T,Ht)@(Ht,bb*C) per grid step.
        y1 = a1s_ref[...] * xs_ref[...] + be1s_ref[...]                 # (T, bb*C) f32
        h = jnp.dot(w1tT_ref[...], y1.astype(bf16),
                    preferred_element_type=f32) + b1t_ref[...]          # (Ht, bb*C)
        h = _gelu(h, approximate_gelu)
        u = jnp.dot(w2tT_ref[...], h.astype(bf16),
                    preferred_element_type=f32) + b2t_ref[...]          # (T, bb*C)
        u = ls1s_ref[...] * u                                           # scale once (hoisted)

        # Unpack slab columns back to row layout, fused with the residual add.
        # Each iteration stores immediately (bounded live range); slice offsets
        # are static Python ints, so no dynamic lane/sublane addressing.
        for b in range(bb):
            rs, cs = b * T, b * C
            o_ref[rs:rs + T, :] = xr_ref[rs:rs + T, :] + u[:, cs:cs + C]

        # ---- channel-mixing branch: x + ls2 * MLP_C(affine2(x)) ----
        # Batch folded into M; o_ref (still in VMEM) is read back and finished
        # in place — no extra (rows, C) scratch copy.
        xm = o_ref[...]                                                 # (bb*T, C)
        y2 = a2_ref[...] * xm + be2_ref[...]
        h2 = _gelu(jnp.dot(y2.astype(bf16), w1c_ref[...],
                           preferred_element_type=f32) + b1c_ref[...],
                   approximate_gelu)                                    # (bb*T, Hc)
        v = jnp.dot(h2.astype(bf16), w2c_ref[...],
                    preferred_element_type=f32) + b2c_ref[...]          # (bb*T, C)
        o_ref[...] = xm + ls2_ref[...] * v

    param_args = (a1s, be1s, w1t_T, b1t_col, w2t_T, b2t_col, ls1s,
                  a2, be2, w1c, b1c, w2c, b2c, ls2)

    in_specs = [
        pl.BlockSpec((T, bb * C), lambda i: (0, i)),    # x_slab: batch block in lanes
        pl.BlockSpec((rows, C), lambda i: (i, 0)),      # x_rows: batch block in rows
    ]
    in_specs += [_const_spec(p, single_buffer_params) for p in param_args]

    # Advisory cost hint for the surrounding XLA schedule.
    flops = 4 * B * T * C * (Ht + Hc)
    transcendentals = B * (Ht * C + T * Hc)
    bytes_accessed = (4 * 3 * B * T * C
                      + 2 * 2 * (Ht * T + C * Hc)
                      + 4 * (2 * Ht + 2 * T + Hc + 9 * C))

    out2 = pl.pallas_call(
        kernel,
        out_shape=jax.ShapeDtypeStruct((B * T, C), x.dtype),
        grid_spec=pltpu.PrefetchScalarGridSpec(
            num_scalar_prefetch=0,
            grid=(B // bb,),
            in_specs=in_specs,
            out_specs=pl.BlockSpec((rows, C), lambda i: (i, 0)),
        ),
        compiler_params=pltpu.CompilerParams(
            dimension_semantics=("parallel",),
            vmem_limit_bytes=vmem_limit_bytes,
        ),
        cost_estimate=pl.CostEstimate(
            flops=flops, transcendentals=transcendentals,
            bytes_accessed=bytes_accessed),
    )(x_slab, x_rows, *param_args)

    return out2.reshape(B, T, C)


def init_params(key, tokens_dim, channel_dim,
                tokens_mlp_ratio=4, channel_dim_ratio=4, init_values=1e-4):
    T, C = tokens_dim, channel_dim
    Ht = T * tokens_mlp_ratio
    Hc = int(C * channel_dim_ratio)
    ks = jax.random.split(key, 8)
    f32 = jnp.float32

    def lin(kw, kb, fan_in, fan_out):
        w = jax.random.normal(kw, (fan_in, fan_out), f32) / jnp.sqrt(f32(fan_in))
        b = jax.random.normal(kb, (1, fan_out), f32) * 0.01
        return w, b

    w1t, b1t = lin(ks[0], ks[1], T, Ht)
    w2t, b2t = lin(ks[2], ks[3], Ht, T)
    w1c, b1c = lin(ks[4], ks[5], C, Hc)
    w2c, b2c = lin(ks[6], ks[7], Hc, C)

    return {
        "a1": jnp.ones((1, C), f32), "be1": jnp.zeros((1, C), f32),
        "w1t": w1t, "b1t": b1t, "w2t": w2t, "b2t": b2t,
        "ls1": jnp.full((1, C), init_values, f32),
        "a2": jnp.ones((1, C), f32), "be2": jnp.zeros((1, C), f32),
        "w1c": w1c, "b1c": b1c, "w2c": w2c, "b2c": b2c,
        "ls2": jnp.full((1, C), init_values, f32),
    }


def tcm_block_ref(x, p, matmul_dtype=None):
    """Pure-JAX reference of the PyTorch forward (eval mode).

    matmul_dtype=None      -> full f32 reference (PyTorch semantics).
    matmul_dtype=bfloat16  -> operands cast to bf16 with f32 accumulation,
                              matching the kernel's MXU precision.
    """
    cast = (lambda a: a) if matmul_dtype is None else (lambda a: a.astype(matmul_dtype))

    def mm(a, b):
        return jnp.matmul(cast(a), cast(b), preferred_element_type=jnp.float32)

    def gelu(v):
        return 0.5 * v * (1.0 + lax.erf(v * jnp.float32(_SQRT_HALF)))

    y1 = p["a1"] * x + p["be1"]                          # (B, T, C)
    t = jnp.swapaxes(y1, 1, 2)                           # (B, C, T)
    u = mm(gelu(mm(t, p["w1t"]) + p["b1t"]), p["w2t"]) + p["b2t"]
    x = x + p["ls1"] * jnp.swapaxes(u, 1, 2)
    y2 = p["a2"] * x + p["be2"]
    v = mm(gelu(mm(y2, p["w1c"]) + p["b1c"]), p["w2c"]) + p["b2c"]
    return x + p["ls2"] * v


if __name__ == "__main__":
    B, T, C = 4, 8, 32          # batch, tokens_dim, channel_dim (small demo)
    key = jax.random.PRNGKey(0)
    kx, kp = jax.random.split(key)
    x = jax.random.normal(kx, (B, T, C), jnp.float32)
    params = init_params(kp, tokens_dim=T, channel_dim=C)

    out = tcm_block(x, params)          # block_b picked automatically
    out = jax.block_until_ready(out)
    assert out.shape == (B, T, C)

    # Tight check against a reference with matching (bf16-operand) precision.
    ref_bf16 = tcm_block_ref(x, params, matmul_dtype=jnp.bfloat16)
    assert jnp.allclose(out, ref_bf16, atol=1e-4, rtol=1e-4), "mismatch vs bf16-matched reference"

    # Loose check against the full-f32 PyTorch-semantics reference.
    ref_f32 = tcm_block_ref(x, params)
    assert jnp.allclose(out, ref_f32, atol=1e-3, rtol=1e-3), "mismatch vs f32 reference"

    print("KERNEL_OK")
</pallas_src>

<mosaic_0001>
module attributes {stable_mosaic.version = 11 : i64} {
  func.func @kernel(%arg0: i32, %arg1: memref<8x128xf32, #tpu.memory_space<vmem>>, %arg2: memref<32x32xf32, #tpu.memory_space<vmem>>, %arg3: memref<1x128xf32, #tpu.memory_space<vmem>>, %arg4: memref<1x128xf32, #tpu.memory_space<vmem>>, %arg5: memref<32x8xbf16, #tpu.memory_space<vmem>>, %arg6: memref<32x1xf32, #tpu.memory_space<vmem>>, %arg7: memref<8x32xbf16, #tpu.memory_space<vmem>>, %arg8: memref<8x1xf32, #tpu.memory_space<vmem>>, %arg9: memref<1x128xf32, #tpu.memory_space<vmem>>, %arg10: memref<1x32xf32, #tpu.memory_space<vmem>>, %arg11: memref<1x32xf32, #tpu.memory_space<vmem>>, %arg12: memref<32x128xbf16, #tpu.memory_space<vmem>>, %arg13: memref<1x128xf32, #tpu.memory_space<vmem>>, %arg14: memref<128x32xbf16, #tpu.memory_space<vmem>>, %arg15: memref<1x32xf32, #tpu.memory_space<vmem>>, %arg16: memref<1x32xf32, #tpu.memory_space<vmem>>, %arg17: memref<32x32xf32, #tpu.memory_space<vmem>>) attributes {dimension_semantics = [#tpu.dimension_semantics<parallel>], iteration_bounds = array<i64: 1>, scalar_prefetch = 0 : i64, scratch_operands = 0 : i64, tpu.core_type = #tpu.core_type<tc>, window_params = [{transform_indices = @transform_0, window_bounds = array<i64: 8, 128>}, {transform_indices = @transform_1, window_bounds = array<i64: 32, 32>}, {pipeline_mode = #tpu.pipeline_mode<synchronous>, transform_indices = @transform_2, window_bounds = array<i64: 1, 128>}, {pipeline_mode = #tpu.pipeline_mode<synchronous>, transform_indices = @transform_3, window_bounds = array<i64: 1, 128>}, {pipeline_mode = #tpu.pipeline_mode<synchronous>, transform_indices = @transform_4, window_bounds = array<i64: 32, 8>}, {pipeline_mode = #tpu.pipeline_mode<synchronous>, transform_indices = @transform_5, window_bounds = array<i64: 32, 1>}, {pipeline_mode = #tpu.pipeline_mode<synchronous>, transform_indices = @transform_6, window_bounds = array<i64: 8, 32>}, {pipeline_mode = #tpu.pipeline_mode<synchronous>, transform_indices = @transform_7, window_bounds = array<i64: 8, 1>}, {pipeline_mode = #tpu.pipeline_mode<synchronous>, transform_indices = @transform_8, window_bounds = array<i64: 1, 128>}, {pipeline_mode = #tpu.pipeline_mode<synchronous>, transform_indices = @transform_9, window_bounds = array<i64: 1, 32>}, {pipeline_mode = #tpu.pipeline_mode<synchronous>, transform_indices = @transform_10, window_bounds = array<i64: 1, 32>}, {pipeline_mode = #tpu.pipeline_mode<synchronous>, transform_indices = @transform_11, window_bounds = array<i64: 32, 128>}, {pipeline_mode = #tpu.pipeline_mode<synchronous>, transform_indices = @transform_12, window_bounds = array<i64: 1, 128>}, {pipeline_mode = #tpu.pipeline_mode<synchronous>, transform_indices = @transform_13, window_bounds = array<i64: 128, 32>}, {pipeline_mode = #tpu.pipeline_mode<synchronous>, transform_indices = @transform_14, window_bounds = array<i64: 1, 32>}, {pipeline_mode = #tpu.pipeline_mode<synchronous>, transform_indices = @transform_15, window_bounds = array<i64: 1, 32>}, {transform_indices = @transform_16, window_bounds = array<i64: 32, 32>}]} {
    %c0 = arith.constant 0 : index
    %c0_0 = arith.constant 0 : index
    %0 = vector.load %arg3[%c0, %c0_0] : memref<1x128xf32, #tpu.memory_space<vmem>>, vector<1x128xf32>
    %c0_1 = arith.constant 0 : index
    %c0_2 = arith.constant 0 : index
    %1 = vector.load %arg1[%c0_1, %c0_2] : memref<8x128xf32, #tpu.memory_space<vmem>>, vector<8x128xf32>
    %2 = vector.broadcast %0 : vector<1x128xf32> to vector<8x128xf32>
    %3 = arith.mulf %2, %1 : vector<8x128xf32>
    %c0_3 = arith.constant 0 : index
    %c0_4 = arith.constant 0 : index
    %4 = vector.load %arg4[%c0_3, %c0_4] : memref<1x128xf32, #tpu.memory_space<vmem>>, vector<1x128xf32>
    %5 = vector.broadcast %4 : vector<1x128xf32> to vector<8x128xf32>
    %6 = arith.addf %3, %5 : vector<8x128xf32>
    %c0_5 = arith.constant 0 : index
    %c0_6 = arith.constant 0 : index
    %7 = vector.load %arg5[%c0_5, %c0_6] : memref<32x8xbf16, #tpu.memory_space<vmem>>, vector<32x8xbf16>
    %8 = arith.truncf %6 : vector<8x128xf32> to vector<8x128xbf16>
    %cst = arith.constant dense<0.000000e+00> : vector<32x128xf32>
    %9 = tpu.matmul %7, %8, %cst {dimension_numbers = #tpu.dot_dimension_numbers<[1], [0], [0], [1], [0, 0, 1, 1], [], []>} : vector<32x8xbf16>, vector<8x128xbf16>, vector<32x128xf32> -> vector<32x128xf32>
    %c0_7 = arith.constant 0 : index
    %c0_8 = arith.constant 0 : index
    %10 = vector.load %arg6[%c0_7, %c0_8] : memref<32x1xf32, #tpu.memory_space<vmem>>, vector<32x1xf32>
    %11 = vector.broadcast %10 : vector<32x1xf32> to vector<32x128xf32>
    %12 = arith.addf %9, %11 : vector<32x128xf32>
    %cst_9 = arith.constant 5.000000e-01 : f32
    %13 = vector.broadcast %cst_9 : f32 to vector<32x128xf32>
    %14 = arith.mulf %13, %12 : vector<32x128xf32>
    %cst_10 = arith.constant 0.707106769 : f32
    %15 = vector.broadcast %cst_10 : f32 to vector<32x128xf32>
    %16 = arith.mulf %12, %15 : vector<32x128xf32>
    %17 = math.erf %16 : vector<32x128xf32>
    %cst_11 = arith.constant 1.000000e+00 : f32
    %18 = vector.broadcast %cst_11 : f32 to vector<32x128xf32>
    %19 = arith.addf %18, %17 : vector<32x128xf32>
    %20 = arith.mulf %14, %19 : vector<32x128xf32>
    %c0_12 = arith.constant 0 : index
    %c0_13 = arith.constant 0 : index
    %21 = vector.load %arg7[%c0_12, %c0_13] : memref<8x32xbf16, #tpu.memory_space<vmem>>, vector<8x32xbf16>
    %22 = arith.truncf %20 : vector<32x128xf32> to vector<32x128xbf16>
    %cst_14 = arith.constant dense<0.000000e+00> : vector<8x128xf32>
    %23 = tpu.matmul %21, %22, %cst_14 {dimension_numbers = #tpu.dot_dimension_numbers<[1], [0], [0], [1], [0, 0, 1, 1], [], []>} : vector<8x32xbf16>, vector<32x128xbf16>, vector<8x128xf32> -> vector<8x128xf32>
    %c0_15 = arith.constant 0 : index
    %c0_16 = arith.constant 0 : index
    %24 = vector.load %arg8[%c0_15, %c0_16] : memref<8x1xf32, #tpu.memory_space<vmem>>, vector<8x1xf32>
    %25 = vector.broadcast %24 : vector<8x1xf32> to vector<8x128xf32>
    %26 = arith.addf %23, %25 : vector<8x128xf32>
    %c0_17 = arith.constant 0 : index
    %c0_18 = arith.constant 0 : index
    %27 = vector.load %arg9[%c0_17, %c0_18] : memref<1x128xf32, #tpu.memory_space<vmem>>, vector<1x128xf32>
    %28 = vector.broadcast %27 : vector<1x128xf32> to vector<8x128xf32>
    %29 = arith.mulf %28, %26 : vector<8x128xf32>
    %c0_19 = arith.constant 0 : index
    %c0_20 = arith.constant 0 : index
    %30 = vector.load %arg2[%c0_19, %c0_20] : memref<32x32xf32, #tpu.memory_space<vmem>>, vector<8x32xf32>
    %31 = vector.extract_strided_slice %29 {offsets = [0, 0], sizes = [8, 32], strides = [1, 1]} : vector<8x128xf32> to vector<8x32xf32>
    %32 = arith.addf %30, %31 : vector<8x32xf32>
    %c0_21 = arith.constant 0 : index
    %c0_22 = arith.constant 0 : index
    %33 = vector.load %arg17[%c0_21, %c0_22] : memref<32x32xf32, #tpu.memory_space<vmem>>, vector<8x32xf32>
    tpu.vector_store %arg17[%c0_21, %c0_22], %32 {strides = array<i32>} : memref<32x32xf32, #tpu.memory_space<vmem>>, vector<8x32xf32>,
    %c8 = arith.constant 8 : index
    %c0_23 = arith.constant 0 : index
    %34 = vector.load %arg2[%c8, %c0_23] : memref<32x32xf32, #tpu.memory_space<vmem>>, vector<8x32xf32>
    %35 = vector.extract_strided_slice %29 {offsets = [0, 32], sizes = [8, 32], strides = [1, 1]} : vector<8x128xf32> to vector<8x32xf32>
    %36 = arith.addf %34, %35 : vector<8x32xf32>
    %c8_24 = arith.constant 8 : index
    %c0_25 = arith.constant 0 : index
    %37 = vector.load %arg17[%c8_24, %c0_25] : memref<32x32xf32, #tpu.memory_space<vmem>>, vector<8x32xf32>
    tpu.vector_store %arg17[%c8_24, %c0_25], %36 {strides = array<i32>} : memref<32x32xf32, #tpu.memory_space<vmem>>, vector<8x32xf32>,
    %c16 = arith.constant 16 : index
    %c0_26 = arith.constant 0 : index
    %38 = vector.load %arg2[%c16, %c0_26] : memref<32x32xf32, #tpu.memory_space<vmem>>, vector<8x32xf32>
    %39 = vector.extract_strided_slice %29 {offsets = [0, 64], sizes = [8, 32], strides = [1, 1]} : vector<8x128xf32> to vector<8x32xf32>
    %40 = arith.addf %38, %39 : vector<8x32xf32>
    %c16_27 = arith.constant 16 : index
    %c0_28 = arith.constant 0 : index
    %41 = vector.load %arg17[%c16_27, %c0_28] : memref<32x32xf32, #tpu.memory_space<vmem>>, vector<8x32xf32>
    tpu.vector_store %arg17[%c16_27, %c0_28], %40 {strides = array<i32>} : memref<32x32xf32, #tpu.memory_space<vmem>>, vector<8x32xf32>,
    %c24 = arith.constant 24 : index
    %c0_29 = arith.constant 0 : index
    %42 = vector.load %arg2[%c24, %c0_29] : memref<32x32xf32, #tpu.memory_space<vmem>>, vector<8x32xf32>
    %43 = vector.extract_strided_slice %29 {offsets = [0, 96], sizes = [8, 32], strides = [1, 1]} : vector<8x128xf32> to vector<8x32xf32>
    %44 = arith.addf %42, %43 : vector<8x32xf32>
    %c24_30 = arith.constant 24 : index
    %c0_31 = arith.constant 0 : index
    %45 = vector.load %arg17[%c24_30, %c0_31] : memref<32x32xf32, #tpu.memory_space<vmem>>, vector<8x32xf32>
    tpu.vector_store %arg17[%c24_30, %c0_31], %44 {strides = array<i32>} : memref<32x32xf32, #tpu.memory_space<vmem>>, vector<8x32xf32>,
    %c0_32 = arith.constant 0 : index
    %c0_33 = arith.constant 0 : index
    %46 = vector.load %arg17[%c0_32, %c0_33] : memref<32x32xf32, #tpu.memory_space<vmem>>, vector<32x32xf32>
    %c0_34 = arith.constant 0 : index
    %c0_35 = arith.constant 0 : index
    %47 = vector.load %arg10[%c0_34, %c0_35] : memref<1x32xf32, #tpu.memory_space<vmem>>, vector<1x32xf32>
    %48 = vector.broadcast %47 : vector<1x32xf32> to vector<32x32xf32>
    %49 = arith.mulf %48, %46 : vector<32x32xf32>
    %c0_36 = arith.constant 0 : index
    %c0_37 = arith.constant 0 : index
    %50 = vector.load %arg11[%c0_36, %c0_37] : memref<1x32xf32, #tpu.memory_space<vmem>>, vector<1x32xf32>
    %51 = vector.broadcast %50 : vector<1x32xf32> to vector<32x32xf32>
    %52 = arith.addf %49, %51 : vector<32x32xf32>
    %53 = arith.truncf %52 : vector<32x32xf32> to vector<32x32xbf16>
    %c0_38 = arith.constant 0 : index
    %c0_39 = arith.constant 0 : index
    %54 = vector.load %arg12[%c0_38, %c0_39] : memref<32x128xbf16, #tpu.memory_space<vmem>>, vector<32x128xbf16>
    %cst_40 = arith.constant dense<0.000000e+00> : vector<32x128xf32>
    %55 = tpu.matmul %53, %54, %cst_40 {dimension_numbers = #tpu.dot_dimension_numbers<[1], [0], [0], [1], [0, 0, 1, 1], [], []>} : vector<32x32xbf16>, vector<32x128xbf16>, vector<32x128xf32> -> vector<32x128xf32>
    %c0_41 = arith.constant 0 : index
    %c0_42 = arith.constant 0 : index
    %56 = vector.load %arg13[%c0_41, %c0_42] : memref<1x128xf32, #tpu.memory_space<vmem>>, vector<1x128xf32>
    %57 = vector.broadcast %56 : vector<1x128xf32> to vector<32x128xf32>
    %58 = arith.addf %55, %57 : vector<32x128xf32>
    %cst_43 = arith.constant 5.000000e-01 : f32
    %59 = vector.broadcast %cst_43 : f32 to vector<32x128xf32>
    %60 = arith.mulf %59, %58 : vector<32x128xf32>
    %cst_44 = arith.constant 0.707106769 : f32
    %61 = vector.broadcast %cst_44 : f32 to vector<32x128xf32>
    %62 = arith.mulf %58, %61 : vector<32x128xf32>
    %63 = math.erf %62 : vector<32x128xf32>
    %cst_45 = arith.constant 1.000000e+00 : f32
    %64 = vector.broadcast %cst_45 : f32 to vector<32x128xf32>
    %65 = arith.addf %64, %63 : vector<32x128xf32>
    %66 = arith.mulf %60, %65 : vector<32x128xf32>
    %67 = arith.truncf %66 : vector<32x128xf32> to vector<32x128xbf16>
    %c0_46 = arith.constant 0 : index
    %c0_47 = arith.constant 0 : index
    %68 = vector.load %arg14[%c0_46, %c0_47] : memref<128x32xbf16, #tpu.memory_space<vmem>>, vector<128x32xbf16>
    %cst_48 = arith.constant dense<0.000000e+00> : vector<32x32xf32>
    %69 = tpu.matmul %67, %68, %cst_48 {dimension_numbers = #tpu.dot_dimension_numbers<[1], [0], [0], [1], [0, 0, 1, 1], [], []>} : vector<32x128xbf16>, vector<128x32xbf16>, vector<32x32xf32> -> vector<32x32xf32>
    %c0_49 = arith.constant 0 : index
    %c0_50 = arith.constant 0 : index
    %70 = vector.load %arg15[%c0_49, %c0_50] : memref<1x32xf32, #tpu.memory_space<vmem>>, vector<1x32xf32>
    %71 = vector.broadcast %70 : vector<1x32xf32> to vector<32x32xf32>
    %72 = arith.addf %69, %71 : vector<32x32xf32>
    %c0_51 = arith.constant 0 : index
    %c0_52 = arith.constant 0 : index
    %73 = vector.load %arg16[%c0_51, %c0_52] : memref<1x32xf32, #tpu.memory_space<vmem>>, vector<1x32xf32>
    %74 = vector.broadcast %73 : vector<1x32xf32> to vector<32x32xf32>
    %75 = arith.mulf %74, %72 : vector<32x32xf32>
    %76 = arith.addf %46, %75 : vector<32x32xf32>
    %c0_53 = arith.constant 0 : index
    %c0_54 = arith.constant 0 : index
    %77 = vector.load %arg17[%c0_53, %c0_54] : memref<32x32xf32, #tpu.memory_space<vmem>>, vector<32x32xf32>
    tpu.vector_store %arg17[%c0_53, %c0_54], %76 {strides = array<i32>} : memref<32x32xf32, #tpu.memory_space<vmem>>, vector<32x32xf32>,
    return
  }
  func.func @transform_0(%arg0: i32) -> (i32, i32) {
    %c0_i32 = arith.constant 0 : i32
    %c0_i32_0 = arith.constant 0 : i32
    return %c0_i32, %arg0 : i32, i32
  }
  func.func @transform_1(%arg0: i32) -> (i32, i32) {
    %c0_i32 = arith.constant 0 : i32
    %c0_i32_0 = arith.constant 0 : i32
    return %arg0, %c0_i32 : i32, i32
  }
  func.func @transform_2(%arg0: i32) -> (i32, i32) {
    %c0_i32 = arith.constant 0 : i32
    %c0_i32_0 = arith.constant 0 : i32
    %c0_i32_1 = arith.constant 0 : i32
    return %c0_i32, %c0_i32_0 : i32, i32
  }
  func.func @transform_3(%arg0: i32) -> (i32, i32) {
    %c0_i32 = arith.constant 0 : i32
    %c0_i32_0 = arith.constant 0 : i32
    %c0_i32_1 = arith.constant 0 : i32
    return %c0_i32, %c0_i32_0 : i32, i32
  }
  func.func @transform_4(%arg0: i32) -> (i32, i32) {
    %c0_i32 = arith.constant 0 : i32
    %c0_i32_0 = arith.constant 0 : i32
    %c0_i32_1 = arith.constant 0 : i32
    return %c0_i32, %c0_i32_0 : i32, i32
  }
  func.func @transform_5(%arg0: i32) -> (i32, i32) {
    %c0_i32 = arith.constant 0 : i32
    %c0_i32_0 = arith.constant 0 : i32
    %c0_i32_1 = arith.constant 0 : i32
    return %c0_i32, %c0_i32_0 : i32, i32
  }
  func.func @transform_6(%arg0: i32) -> (i32, i32) {
    %c0_i32 = arith.constant 0 : i32
    %c0_i32_0 = arith.constant 0 : i32
    %c0_i32_1 = arith.constant 0 : i32
    return %c0_i32, %c0_i32_0 : i32, i32
  }
  func.func @transform_7(%arg0: i32) -> (i32, i32) {
    %c0_i32 = arith.constant 0 : i32
    %c0_i32_0 = arith.constant 0 : i32
    %c0_i32_1 = arith.constant 0 : i32
    return %c0_i32, %c0_i32_0 : i32, i32
  }
  func.func @transform_8(%arg0: i32) -> (i32, i32) {
    %c0_i32 = arith.constant 0 : i32
    %c0_i32_0 = arith.constant 0 : i32
    %c0_i32_1 = arith.constant 0 : i32
    return %c0_i32, %c0_i32_0 : i32, i32
  }
  func.func @transform_9(%arg0: i32) -> (i32, i32) {
    %c0_i32 = arith.constant 0 : i32
    %c0_i32_0 = arith.constant 0 : i32
    %c0_i32_1 = arith.constant 0 : i32
    return %c0_i32, %c0_i32_0 : i32, i32
  }
  func.func @transform_10(%arg0: i32) -> (i32, i32) {
    %c0_i32 = arith.constant 0 : i32
    %c0_i32_0 = arith.constant 0 : i32
    %c0_i32_1 = arith.constant 0 : i32
    return %c0_i32, %c0_i32_0 : i32, i32
  }
  func.func @transform_11(%arg0: i32) -> (i32, i32) {
    %c0_i32 = arith.constant 0 : i32
    %c0_i32_0 = arith.constant 0 : i32
    %c0_i32_1 = arith.constant 0 : i32
    return %c0_i32, %c0_i32_0 : i32, i32
  }
  func.func @transform_12(%arg0: i32) -> (i32, i32) {
    %c0_i32 = arith.constant 0 : i32
    %c0_i32_0 = arith.constant 0 : i32
    %c0_i32_1 = arith.constant 0 : i32
    return %c0_i32, %c0_i32_0 : i32, i32
  }
  func.func @transform_13(%arg0: i32) -> (i32, i32) {
    %c0_i32 = arith.constant 0 : i32
    %c0_i32_0 = arith.constant 0 : i32
    %c0_i32_1 = arith.constant 0 : i32
    return %c0_i32, %c0_i32_0 : i32, i32
  }
  func.func @transform_14(%arg0: i32) -> (i32, i32) {
    %c0_i32 = arith.constant 0 : i32
    %c0_i32_0 = arith.constant 0 : i32
    %c0_i32_1 = arith.constant 0 : i32
    return %c0_i32, %c0_i32_0 : i32, i32
  }
  func.func @transform_15(%arg0: i32) -> (i32, i32) {
    %c0_i32 = arith.constant 0 : i32
    %c0_i32_0 = arith.constant 0 : i32
    %c0_i32_1 = arith.constant 0 : i32
    return %c0_i32, %c0_i32_0 : i32, i32
  }
  func.func @transform_16(%arg0: i32) -> (i32, i32) {
    %c0_i32 = arith.constant 0 : i32
    %c0_i32_0 = arith.constant 0 : i32
    return %arg0, %c0_i32 : i32, i32
  }
}

</mosaic_0001>

<bundles_post_ra>
// kernel: tpu_custom_call.1
= control target key start
LH: loop header
LB: loop body
LE: loop exit
PB: predicated region body
PF: predicated region fallthrough
CT: control target
= control target key end

     0   :  { %s1312_s0 = inlined_call_operand.vmem [shape: f32[8,128], index: 0, kind: input, shape index: {}]   ;;  %s1313_s1 = inlined_call_operand.vmem [shape: f32[32,32], index: 1, kind: input, shape index: {}]   ;;  %s1314_s2 = inlined_call_operand.vmem [shape: f32[1,128], index: 2, kind: input, shape index: {}]   ;;  %s1315_s3 = inlined_call_operand.vmem [shape: f32[1,128], index: 3, kind: input, shape index: {}]   ;;  %s1316_s4 = inlined_call_operand.vmem [shape: bf16[32,8], index: 4, kind: input, shape index: {}]   ;;  %s1317_s5 = inlined_call_operand.vmem [shape: f32[32,1], index: 5, kind: input, shape index: {}]   ;;  %s1318_s6 = inlined_call_operand.vmem [shape: bf16[8,32], index: 6, kind: input, shape index: {}]   ;;  %s1319_s7 = inlined_call_operand.vmem [shape: f32[8,1], index: 7, kind: input, shape index: {}]   ;;  %s1320_s8 = inlined_call_operand.vmem [shape: f32[1,128], index: 8, kind: input, shape index: {}]   ;;  %s1321_s9 = inlined_call_operand.vmem [shape: f32[1,32], index: 9, kind: input, shape index: {}]   ;;  %s1322_s10 = inlined_call_operand.vmem [shape: f32[1,32], index: 10, kind: input, shape index: {}]   ;;  %s1323_s11 = inlined_call_operand.vmem [shape: bf16[32,128], index: 11, kind: input, shape index: {}]   ;;  %s1324_s12 = inlined_call_operand.vmem [shape: f32[1,128], index: 12, kind: input, shape index: {}]   ;;  %s1325_s13 = inlined_call_operand.vmem [shape: bf16[128,32], index: 13, kind: input, shape index: {}]   ;;  %s1326_s14 = inlined_call_operand.vmem [shape: f32[1,32], index: 14, kind: input, shape index: {}]   ;;  %s1327_s15 = inlined_call_operand.vmem [shape: f32[1,32], index: 15, kind: input, shape index: {}]   ;;  %s1328_s16 = inlined_call_operand.hbm [shape: f32[32,32], index: 16, kind: output, shape index: {}]  }
   0x1   :  { %1329 = sst [smem:[#allocation5_spill]] %s1312_s0 }
   0x2   :  { %s1330_s23 = sld [smem:[#allocation5_spill]]  ;;  %v821_v1 = vld [vmem:[%s1314_s2] ss:$0 sm:$0xff]  ;;  %v73_v5 = vld [vmem:[%s1317_s5 + $0x10] sm:$0xff]  ;;  %vm112_vm0 = vcmask 1043456   ;;  %v871_v6 = vmov 0  }
   0x3   :  { %v822_v2 = vld [vmem:[%s1315_s3] ss:$0 sm:$0xff]  ;;  %819 = vset.pattern.permute.xlu1 %v871_v6  ;;  %818 = vset.pattern.permute.xlu0 %v871_v6 }
   0x4   :  { %v71_v4 = vld [vmem:[%s1317_s5] sm:$0xff]  ;;  %87 = vperm.xlu0 %818, %v73_v5   ;;  %820 = vset.pattern.permute.xlu2 %v871_v6 }
   0x5   :  { %77 = vperm.xlu1 %819, %v71_v4  }
   0x8   :  { %v56_v0 = vld [vmem:[%s1330_s23] sm:$0xff] }
   0x9   :  { %v60_v3 = vmul.f32 %v821_v1, %v56_v0 }
   0xb   :  { %v65_v7 = vadd.f32 %v822_v2, %v60_v3 }
   0xc   :  { %21 = vsyncpa [#allocation3], 0  ;;  %v791_v10 = vld [vmem:[%s1316_s4] sm:$0xff]  ;;  %vm105_vm1 = vcmask 64512   ;;  %v72_v11 = vld [vmem:[%s1317_s5 + $0x8] sm:$0xff]  ;;  %s872_s28 = smov 32  }
   0xd   :  { %v70_v8 = vpack.c.bf16 %v65_v7, %v65_v7  ;;  %v74_v12 = vld [vmem:[%s1317_s5 + $0x18] sm:$0xff]  ;;  %82 = vperm.xlu1 %819, %v72_v11   ;;  %v792_v13 = vld [vmem:[%s1316_s4 + $0x8] sm:$0xff]  ;;  %s873_s29 = smov 64   ;;  %s876_s22 = smov 128  }
   0xe   :  { %92 = vperm.xlu0 %818, %v74_v12  }
   0xf   :  { %v114_v9 = vsel %vm112_vm0, %v70_v8, 0 }
  0x10   :  { %123 = vmatpush.bf16.msra.mxu0 %v114_v9 }
  0x13   :  { %738 = vmatmul.msk.bf16.vlgmr.msra.gmra.mxu0 %vm105_vm1, %v791_v10 }
  0x23   :  { %739 = vmatmul.msk.bf16.gmra.mxu0 %vm105_vm1, %v792_v13 }
  0x76   :  { %v88_v27 = vpop.permute.xlu0 %87 }
  0x77   :  { %v78_v14 = vpop.permute.xlu1 %77 }
  0x7f   :  { %v83_v19 = vpop.permute.xlu1 %82 }
  0x80   :  { %v93_v43 = vpop.permute.xlu0 %92 }
  0x90   :  { %v125_v15 = vpop.f32.mrf.mxu0 }
  0x91   :  { %v990_v16 = vadd.f32 %v125_v15, %v78_v14 }
  0x93   :  { %v993_v17 = vmul.f32 0.70710677, %v990_v16 }
  0x95   :  { %v143_v18 = vmul.f32 %v993_v17, %v993_v17 }
  0x97   :  { %v997_v20 = vmin.f32 %v143_v18, 16.0 }
  0x98   :  { %v127_v21 = vpop.f32.mrf.mxu0 }
  0x99   :  { %v999_v22 = vadd.f32 %v127_v21, %v83_v19  ;;  %v156_v23 = vmul.f32 3.8918573e-05, %v997_v20  ;;  %v145_v41 = vmul.f32 2.1237322e-06, %v997_v20 }
  0x9b   :  { %v1003_v24 = vmul.f32 0.70710677, %v999_v22  ;;  %v157_v25 = vadd.f32 0.001143296, %v156_v23  ;;  %v146_v52 = vadd.f32 0.00028619796, %v145_v41 }
  0x9d   :  { %v183_v26 = vmul.f32 %v1003_v24, %v1003_v24  ;;  %v158_v28 = vmul.f32 %v157_v25, %v997_v20  ;;  %v147_v61 = vmul.f32 %v146_v52, %v997_v20 }
  0x9f   :  { %v1008_v29 = vmin.f32 %v183_v26, 16.0  ;;  %v159_v31 = vadd.f32 0.014752088, %v158_v28  ;;  %v148_v7 = vadd.f32 0.0036580483, %v147_v61 }
  0xa0   :  { %v130_v30 = vpop.f32.mrf.mxu0 }
  0xa1   :  { %v1010_v32 = vadd.f32 %v130_v30, %v88_v27  ;;  %v196_v33 = vmul.f32 3.8918573e-05, %v1008_v29  ;;  %v160_v34 = vmul.f32 %v159_v31, %v997_v20  ;;  %v185_v42 = vmul.f32 2.1237322e-06, %v1008_v29 }
  0xa2   :  { %v149_v19 = vmul.f32 %v148_v7, %v997_v20 }
  0xa3   :  { %v1015_v35 = vmul.f32 0.70710677, %v1010_v32  ;;  %v161_v36 = vadd.f32 0.112945676, %v160_v34  ;;  %v197_v37 = vadd.f32 0.001143296, %v196_v33 }
  0xa4   :  { %v186_v53 = vadd.f32 0.00028619796, %v185_v42  ;;  %v150_v34 = vadd.f32 0.05243302, %v149_v19 }
  0xa5   :  { %v223_v38 = vmul.f32 %v1015_v35, %v1015_v35  ;;  %v162_v39 = vmul.f32 %v161_v36, %v997_v20  ;;  %v198_v40 = vmul.f32 %v197_v37, %v1008_v29 }
  0xa6   :  { %v187_v62 = vmul.f32 %v186_v53, %v1008_v29 }
  0xa7   :  { %v1023_v44 = vmin.f32 %v223_v38, 16.0  ;;  %v199_v46 = vadd.f32 0.014752088, %v198_v40  ;;  %v163_v48 = vadd.f32 0.4994258, %v162_v39 }
  0xa8   :  { %v132_v45 = vpop.f32.mrf.mxu0  ;;  %v188_v8 = vadd.f32 0.0036580483, %v187_v62 }
  0xa9   :  { %v1025_v47 = vadd.f32 %v132_v45, %v93_v43  ;;  %v225_v49 = vmul.f32 2.1237322e-06, %v1023_v44  ;;  %v236_v50 = vmul.f32 3.8918573e-05, %v1023_v44  ;;  %v200_v51 = vmul.f32 %v199_v46, %v1008_v29 }
  0xaa   :  { %v164_v57 = vmul.f32 %v163_v48, %v997_v20  ;;  %v189_v25 = vmul.f32 %v188_v8, %v1008_v29  ;;  %v151_v45 = vmul.f32 %v150_v34, %v997_v20 }
  0xab   :  { %v226_v54 = vadd.f32 0.00028619796, %v225_v49  ;;  %v1031_v55 = vmul.f32 0.70710677, %v1025_v47  ;;  %v237_v56 = vadd.f32 0.001143296, %v236_v50 }
  0xac   :  { %v201_v58 = vadd.f32 0.112945676, %v200_v51  ;;  %v1042_v2 = vadd.f32 1.0, %v164_v57  ;;  %v190_v37 = vadd.f32 0.05243302, %v189_v25 }
  0xad   :  { %v263_v59 = vmul.f32 %v1031_v55, %v1031_v55  ;;  %v238_v60 = vmul.f32 %v237_v56, %v1023_v44  ;;  %v227_v63 = vmul.f32 %v226_v54, %v1023_v44  ;;  %v152_v56 = vadd.f32 0.18741608, %v151_v45 }
  0xae   :  { %v202_v3 = vmul.f32 %v201_v58, %v1008_v29  ;;  %829 = vrcp.f32 %v1042_v2  ;;  %v191_v48 = vmul.f32 %v190_v37, %v1008_v29  ;;  %vm171_vm2 = vweird.f32 %v1042_v2 }
  0xaf   :  { %v1040_v0 = vmin.f32 %v263_v59, 16.0  ;;  %v239_v1 = vadd.f32 0.014752088, %v238_v60  ;;  %v228_v10 = vadd.f32 0.0036580483, %v227_v63 }
  0xb0   :  { %v203_v9 = vadd.f32 0.4994258, %v202_v3  ;;  %v192_v59 = vadd.f32 0.18741608, %v191_v48  ;;  %v175_v8 = vand.u32 2147483647, %v1042_v2 }
  0xb1   :  { %v265_v4 = vmul.f32 2.1237322e-06, %v1040_v0  ;;  %v240_v5 = vmul.f32 %v239_v1, %v1023_v44  ;;  %v276_v6 = vmul.f32 3.8918573e-05, %v1040_v0  ;;  %v229_v26 = vmul.f32 %v228_v10, %v1023_v44 }
  0xb2   :  { %v204_v14 = vmul.f32 %v203_v9, %v1008_v29  ;;  %vm176_vm12 = vcmp.eq.f32.partialorder %v175_v8, 8.507059e+37 }
  0xb3   :  { %v266_v11 = vadd.f32 0.00028619796, %v265_v4  ;;  %v241_v12 = vadd.f32 0.112945676, %v240_v5  ;;  %v277_v13 = vadd.f32 0.001143296, %v276_v6  ;;  %v153_v4 = vmul.f32 %v152_v56, %v997_v20 }
  0xb4   :  { %v1054_v23 = vadd.f32 1.0, %v204_v14  ;;  %v1060_v33 = vpop.eup %829  ;;  %v230_v38 = vadd.f32 0.05243302, %v229_v26  ;;  %v193_v6 = vmul.f32 %v192_v59, %v1008_v29  ;;  %v314_v20 = vld [vmem:[%s1319_s7] sm:$0xff] }
  0xb5   :  { %v267_v15 = vmul.f32 %v266_v11, %v1040_v0  ;;  %v242_v18 = vmul.f32 %v241_v12, %v1023_v44  ;;  %v278_v21 = vmul.f32 %v277_v13, %v1040_v0  ;;  %v167_v42 = vmul.f32 %v1060_v33, %v1042_v2  ;;  %317 = vperm.xlu2 %820, %v314_v20  }
  0xb6   :  { %831 = vrcp.f32 %v1054_v23  ;;  %v231_v49 = vmul.f32 %v230_v38, %v1023_v44  ;;  %vm172_vm3 = vweird.f32 %v1060_v33  ;;  %v194_v19 = vadd.f32 1.1283791, %v193_v6 }
  0xb7   :  { %v243_v27 = vadd.f32 0.4994258, %v242_v18  ;;  %v268_v28 = vadd.f32 0.0036580483, %v267_v15  ;;  %v279_v30 = vadd.f32 0.014752088, %v278_v21  ;;  %vm1095_vm7 = vmor %vm171_vm2, %vm172_vm3  ;;  %vm211_vm9 = vweird.f32 %v1054_v23 }
  0xb8   :  { %v168_v53 = vsub.f32 1.0, %v167_v42  ;;  %v232_v60 = vadd.f32 0.18741608, %v231_v49  ;;  %v177_v15 = vand.u32 2147483648, %v1042_v2  ;;  %v217_v18 = vand.u32 2147483648, %v1054_v23 }
  0xb9   :  { %v244_v31 = vmul.f32 %v243_v27, %v1023_v44  ;;  %v280_v36 = vmul.f32 %v279_v30, %v1040_v0  ;;  %v269_v40 = vmul.f32 %v268_v28, %v1040_v0  ;;  %v215_v25 = vand.u32 2147483647, %v1054_v23 }
  0xba   :  { %v169_v1 = vmul.f32 %v1060_v33, %v168_v53  ;;  %v233_v7 = vmul.f32 %v232_v60, %v1023_v44  ;;  %v154_v27 = vadd.f32 1.1283791, %v153_v4  ;;  %v178_v37 = vor.u32 1.1754944e-38, %v177_v15  ;;  %v794_v44 = vld [vmem:[%s1323_s11 + $0x8] sm:$0xff]  ;;  %v793_v15 = vld [vmem:[%s1323_s11] sm:$0xff]  ;;  %s718_s11 = sshll.u32 %s1328_s16, 4  ;;  %s719_s11 = int_to_ptr.hbm [resolvable:$true] %s718_s11 }
  0xbb   :  { %v245_v39 = vadd.f32 1.0, %v244_v31  ;;  %v281_v41 = vadd.f32 0.112945676, %v280_v36  ;;  %v270_v51 = vadd.f32 0.05243302, %v269_v40  ;;  %v218_v38 = vor.u32 1.1754944e-38, %v217_v18  ;;  %418 = vmatpush.bf16.msra.mxu2 %v794_v44 }
  0xbc   :  { %v1066_v43 = vpop.eup %831  ;;  %v170_v13 = vadd.f32 %v1060_v33, %v169_v1  ;;  %v234_v21 = vadd.f32 1.1283791, %v233_v7  ;;  %vm216_vm13 = vcmp.eq.f32.partialorder %v215_v25, 8.507059e+37  ;;  %v138_v1 = vmul.f32 0.5, %v1025_v47  ;;  %v345_v18 = vld [vmem:[%s1313_s1 + $0x8] sm:$0xff] }
  0xbd   :  { %833 = vrcp.f32 %v245_v39  ;;  %v282_v46 = vmul.f32 %v281_v41, %v1040_v0  ;;  %v207_v50 = vmul.f32 %v1066_v43, %v1054_v23  ;;  %v271_v61 = vmul.f32 %v270_v51, %v1040_v0  ;;  %v824_v25 = vld [vmem:[%s1321_s9] ss:$0 sm:$0xff]  ;;  %s877_s9 = smov 8  }
  0xbe   :  { %v257_v11 = vand.u32 2147483648, %v245_v39  ;;  %v255_v12 = vand.u32 2147483647, %v245_v39  ;;  %vm212_vm5 = vweird.f32 %v1066_v43  ;;  %vm251_vm6 = vweird.f32 %v245_v39 }
  0xbf   :  { %v283_v52 = vadd.f32 0.4994258, %v282_v46  ;;  %v208_v54 = vsub.f32 1.0, %v207_v50  ;;  %v272_v9 = vadd.f32 0.18741608, %v271_v61  ;;  %vm1107_vm10 = vmor %vm211_vm9, %vm212_vm5  ;;  %v174_v36 = vsel %vm1095_vm7, %v1060_v33, %v170_v13  ;;  %419 = vmatpush.bf16.msra.mxu2 %v793_v15 }
  0xc0   :  { %v258_v31 = vor.u32 1.1754944e-38, %v257_v11  ;;  %vm256_vm11 = vcmp.eq.f32.partialorder %v255_v12, 8.507059e+37  ;;  %v235_v40 = vmul.f32 %v234_v21, %v1015_v35  ;;  %v179_v46 = vsel %vm176_vm12, %v178_v37, %v174_v36  ;;  %v342_v12 = vld [vmem:[%s1313_s1] sm:$0xff] }
  0xc1   :  { %v284_v57 = vmul.f32 %v283_v52, %v1040_v0  ;;  %v209_v3 = vmul.f32 %v1066_v43, %v208_v54  ;;  %v273_v28 = vmul.f32 %v272_v9, %v1040_v0  ;;  %v155_v50 = vmul.f32 %v154_v27, %v993_v17 }
  0xc2   :  { %v137_v17 = vmul.f32 0.5, %v1010_v32  ;;  %v136_v4 = vmul.f32 0.5, %v999_v22  ;;  %v135_v7 = vmul.f32 0.5, %v990_v16  ;;  %v311_v32 = vld [vmem:[%s1318_s6] sm:$0xf]  ;;  %vm320_vm2 = vcmask 261120  }
  0xc3   :  { %v834_v58 = vpop.eup %833  ;;  %v1076_v63 = vadd.f32 1.0, %v284_v57  ;;  %v210_v14 = vadd.f32 %v1066_v43, %v209_v3  ;;  %v274_v42 = vadd.f32 1.1283791, %v273_v28  ;;  %v180_v52 = vmul.f32 %v179_v46, %v155_v50  ;;  %v823_v22 = vld [vmem:[%s1320_s8] ss:$0 sm:$0xff]  ;;  %s874_s6 = smov 96  }
  0xc4   :  { %v247_v62 = vmul.f32 %v834_v58, %v245_v39  ;;  %vm252_vm4 = vweird.f32 %v834_v58  ;;  %v195_v39 = vmul.f32 %v194_v19, %v1003_v24  ;;  %v825_v28 = vld [vmem:[%s1322_s10] ss:$0 sm:$0xff] }
  0xc5   :  { %835 = vrcp.f32 %v1076_v63  ;;  %vm253_vm8 = vmor %vm251_vm6, %vm252_vm4  ;;  %v214_v23 = vsel %vm1107_vm10, %v1066_v43, %v210_v14  ;;  %v297_v45 = vand.u32 2147483648, %v1076_v63  ;;  %v295_v43 = vand.u32 2147483647, %v1076_v63 }
  0xc6   :  { %v248_v5 = vsub.f32 1.0, %v247_v62  ;;  %v219_v48 = vsel %vm216_vm13, %v218_v38, %v214_v23  ;;  %vm291_vm15 = vweird.f32 %v1076_v63  ;;  %v275_v53 = vmul.f32 %v274_v42, %v1031_v55  ;;  %v358_v23 = vld [vmem:[%s1313_s1 + $0x18] sm:$0xff] }
  0xc7   :  { %v220_v24 = vmul.f32 %v219_v48, %v195_v39  ;;  %v298_v35 = vor.u32 1.1754944e-38, %v297_v45  ;;  %vm296_vm1 = vcmp.eq.f32.partialorder %v295_v43, 8.507059e+37  ;;  %v740_v62 = vclamps-f32 %v180_v52, 1.0  ;;  %v1181_v43 = vld [vmem:[%s1324_s12] ss:$0 sm:$0xff] }
  0xc8   :  { %v249_v10 = vmul.f32 %v834_v58, %v248_v5 }
  0xc9   :  { %v741_v59 = vclamps-f32 %v220_v24, 1.0  ;;  %v303_v55 = vadd.f32 1.0, %v740_v62  ;;  %v802_v24 = vld [vmem:[%s1325_s13 + $0x38] sm:$0xff] }
  0xca   :  { %v250_v29 = vadd.f32 %v834_v58, %v249_v10  ;;  %677 = vmatpush.bf16.msra.mxu1 %v802_v24  ;;  %803 = vmatpush.bf16.msra.mxu3 %v802_v24 }
  0xcb   :  { %v836_v26 = vpop.eup %835  ;;  %v304_v3 = vadd.f32 1.0, %v741_v59  ;;  %v307_v10 = vmul.f32 %v303_v55, %v135_v7 }
  0xcc   :  { %v254_v30 = vsel %vm253_vm8, %v834_v58, %v250_v29  ;;  %v287_v34 = vmul.f32 %v836_v26, %v1076_v63  ;;  %vm292_vm14 = vweird.f32 %v836_v26 }
  0xcd   :  { %v259_v0 = vsel %vm256_vm11, %v258_v31, %v254_v30  ;;  %vm293_vm0 = vmor %vm291_vm15, %vm292_vm14  ;;  %v308_v9 = vmul.f32 %v304_v3, %v136_v4 }
  0xce   :  { %v288_v41 = vsub.f32 1.0, %v287_v34  ;;  %v260_v33 = vmul.f32 %v259_v0, %v235_v40  ;;  %v352_v0 = vld [vmem:[%s1313_s1 + $0x10] sm:$0xff] }
  0xcf   :  { %v312_v11 = vpack.c.bf16 %v308_v9, %v307_v10 }
  0xd0   :  { %v289_v49 = vmul.f32 %v836_v26, %v288_v41  ;;  %v742_v54 = vclamps-f32 %v260_v33, 1.0 }
  0xd2   :  { %v290_v51 = vadd.f32 %v836_v26, %v289_v49  ;;  %v305_v61 = vadd.f32 1.0, %v742_v54 }
  0xd4   :  { %v294_v56 = vsel %vm293_vm0, %v836_v26, %v290_v51  ;;  %v309_v5 = vmul.f32 %v305_v61, %v137_v17 }
  0xd5   :  { %v299_v57 = vsel %vm296_vm1, %v298_v35, %v294_v56 }
  0xd6   :  { %v300_v58 = vmul.f32 %v299_v57, %v275_v53  ;;  %v801_v53 = vld [vmem:[%s1325_s13 + $0x30] sm:$0xff] }
  0xd7   :  { %678 = vmatpush.bf16.msra.mxu1 %v801_v53  ;;  %804 = vmatpush.bf16.msra.mxu3 %v801_v53 }
  0xd8   :  { %v743_v60 = vclamps-f32 %v300_v58, 1.0 }
  0xda   :  { %v306_v63 = vadd.f32 1.0, %v743_v60  ;;  %v800_v60 = vld [vmem:[%s1325_s13 + $0x28] sm:$0xff] }
  0xdb   :  { %679 = vmatpush.bf16.msra.mxu1 %v800_v60  ;;  %805 = vmatpush.bf16.msra.mxu3 %v800_v60 }
  0xdc   :  { %v310_v6 = vmul.f32 %v306_v63, %v138_v1  ;;  %v799_v63 = vld [vmem:[%s1325_s13 + $0x20] sm:$0xff] }
  0xde   :  { %v313_v8 = vpack.c.bf16 %v310_v6, %v309_v5 }
  0xdf   :  { %680 = vmatpush.bf16.msra.mxu1 %v799_v63  ;;  %806 = vmatpush.bf16.msra.mxu3 %v799_v63 }
  0xe0   :  { %330 = vmatpush.bf16.msrb.mxu0 %v313_v8  ;;  %v798_v8 = vld [vmem:[%s1325_s13 + $0x18] sm:$0xff] }
  0xe3   :  { %681 = vmatpush.bf16.msra.mxu1 %v798_v8  ;;  %807 = vmatpush.bf16.msra.mxu3 %v798_v8 }
  0xe4   :  { %331 = vmatpush.bf16.msrb.mxu0 %v312_v11 }
  0xe7   :  { %744 = vmatmul.msk.bf16.vlgmr.msrb.gmra.mxu0 %vm320_vm2, %v311_v32 }
 0x10f   :  { %v318_v47 = vpop.permute.xlu2 %317 }
 0x164   :  { %v333_v20 = vpop.f32.mrf.mxu0 }
 0x165   :  { %v334_v16 = vadd.f32 %v333_v20, %v318_v47 }
 0x167   :  { %v341_v13 = vmul.f32 %v823_v22, %v334_v16  ;;  %v797_v16 = vld [vmem:[%s1325_s13 + $0x10] sm:$0xff] }
 0x168   :  { %682 = vmatpush.bf16.msra.mxu1 %v797_v16  ;;  %808 = vmatpush.bf16.msra.mxu3 %v797_v16 }
 0x169   :  { %v343_v14 = vadd.f32 %v342_v12, %v341_v13  ;;  %359 = vrot.lane.b32.xlu1 %v341_v13, %s872_s28  ;;  %353 = vrot.lane.b32.xlu0 %v341_v13, %s873_s29 }
 0x16a   :  { %347 = vrot.lane.b32.xlu2 %v341_v13, %s874_s6 }
 0x16b   :  { %344 = vst.msk [vmem:[#allocation2] sm:$0xff] %vm320_vm2, %v343_v14 }
 0x16c   :  { %v335_v29 = vpop.f32.mrf.mxu0 }
 0x172   :  { %v1153_v26 = vld [vmem:[#allocation2] sm:$0xff] }
 0x173   :  { %v372_v27 = vmul.f32 %v824_v25, %v1153_v26 }
 0x175   :  { %v380_v2 = vadd.f32 %v825_v28, %v372_v27 }
 0x1c4   :  { %v348_v19 = vpop.permute.xlu2 %347 }
 0x1c5   :  { %v350_v21 = vadd.f32 %v348_v19, %v345_v18 }
 0x1c7   :  { %351 = vst.msk [vmem:[#allocation2 + $0x8] sm:$0xff] %vm320_vm2, %v350_v21  ;;  %v796_v21 = vld [vmem:[%s1325_s13 + $0x8] sm:$0xff] }
 0x1c8   :  { %683 = vmatpush.bf16.msra.mxu1 %v796_v21  ;;  %809 = vmatpush.bf16.msra.mxu3 %v796_v21 }
 0x1ce   :  { %v1159_v30 = vld [vmem:[#allocation2 + $0x8] sm:$0xff] }
 0x1cf   :  { %v373_v31 = vmul.f32 %v824_v25, %v1159_v30 }
 0x1d1   :  { %v381_v34 = vadd.f32 %v825_v28, %v373_v31 }
 0x1d3   :  { %v384_v36 = vpack.c.bf16 %v381_v34, %v380_v2  ;;  %v795_v34 = vld [vmem:[%s1325_s13] sm:$0xff] }
 0x1d4   :  { %684 = vmatpush.bf16.msra.mxu1 %v795_v34  ;;  %810 = vmatpush.bf16.msra.mxu3 %v795_v34 }
 0x1d5   :  { %753 = vmatmul.msk.bf16.vlgmr.msra.gmra.mxu2 %vm320_vm2, %v384_v36 }
 0x1db   :  { %v360_v37 = vpop.permute.xlu1 %359  ;;  %v354_v38 = vpop.permute.xlu0 %353 }
 0x1dc   :  { %v362_v39 = vadd.f32 %v360_v37, %v358_v23  ;;  %v356_v40 = vadd.f32 %v354_v38, %v352_v0 }
 0x1de   :  { %363 = vst.msk [vmem:[#allocation2 + $0x18] sm:$0xff] %vm320_vm2, %v362_v39 }
 0x1df   :  { %357 = vst.msk [vmem:[#allocation2 + $0x10] sm:$0xff] %vm320_vm2, %v356_v40 }
 0x1e5   :  { %v1171_v41 = vld [vmem:[#allocation2 + $0x18] sm:$0xff] }
 0x1e6   :  { %v1173_v42 = vld [vmem:[#allocation2 + $0x10] sm:$0xff]  ;;  %v375_v45 = vmul.f32 %v824_v25, %v1171_v41 }
 0x1e7   :  { %v374_v46 = vmul.f32 %v824_v25, %v1173_v42 }
 0x1e8   :  { %v383_v48 = vadd.f32 %v825_v28, %v375_v45 }
 0x1e9   :  { %v382_v33 = vadd.f32 %v825_v28, %v374_v46 }
 0x1eb   :  { %v385_v49 = vpack.c.bf16 %v383_v48, %v382_v33 }
 0x1ed   :  { %754 = vmatmul.msk.bf16.gmra.mxu2 %vm320_vm2, %v385_v49 }
 0x258   :  { %v421_v50 = vpop.f32.mrf.mxu2 }
 0x259   :  { %v1184_v51 = vadd.f32 %v1181_v43, %v421_v50 }
 0x25b   :  { %v1190_v35 = vmul.f32 0.70710677, %v1184_v51 }
 0x25d   :  { %v439_v52 = vmul.f32 %v1190_v35, %v1190_v35 }
 0x25f   :  { %v1197_v54 = vmin.f32 %v439_v52, 16.0 }
 0x260   :  { %v423_v56 = vpop.f32.mrf.mxu2 }
 0x261   :  { %v441_v57 = vmul.f32 2.1237322e-06, %v1197_v54  ;;  %v1201_v58 = vadd.f32 %v1181_v43, %v423_v56  ;;  %v452_v59 = vmul.f32 3.8918573e-05, %v1197_v54 }
 0x263   :  { %v442_v61 = vadd.f32 0.00028619796, %v441_v57  ;;  %v1208_v62 = vmul.f32 0.70710677, %v1201_v58  ;;  %v453_v17 = vadd.f32 0.001143296, %v452_v59 }
 0x265   :  { %v479_v1 = vmul.f32 %v1208_v62, %v1208_v62  ;;  %v454_v3 = vmul.f32 %v453_v17, %v1197_v54  ;;  %v443_v4 = vmul.f32 %v442_v61, %v1197_v54 }
 0x267   :  { %v1217_v5 = vmin.f32 %v479_v1, 16.0  ;;  %v455_v6 = vadd.f32 0.014752088, %v454_v3  ;;  %v444_v10 = vadd.f32 0.0036580483, %v443_v4 }
 0x269   :  { %v481_v55 = vmul.f32 2.1237322e-06, %v1217_v5  ;;  %v492_v7 = vmul.f32 3.8918573e-05, %v1217_v5  ;;  %v456_v9 = vmul.f32 %v455_v6, %v1197_v54  ;;  %v445_v13 = vmul.f32 %v444_v10, %v1197_v54 }
 0x26b   :  { %v482_v11 = vadd.f32 0.00028619796, %v481_v55  ;;  %v493_v32 = vadd.f32 0.001143296, %v492_v7  ;;  %v457_v47 = vadd.f32 0.112945676, %v456_v9 }
 0x26c   :  { %v446_v27 = vadd.f32 0.05243302, %v445_v13 }
 0x26d   :  { %v494_v22 = vmul.f32 %v493_v32, %v1217_v5  ;;  %v483_v20 = vmul.f32 %v482_v11, %v1217_v5  ;;  %v458_v12 = vmul.f32 %v457_v47, %v1197_v54 }
 0x26e   :  { %v447_v37 = vmul.f32 %v446_v27, %v1197_v54 }
 0x26f   :  { %v495_v14 = vadd.f32 0.014752088, %v494_v22  ;;  %v459_v44 = vadd.f32 0.4994258, %v458_v12  ;;  %v484_v19 = vadd.f32 0.0036580483, %v483_v20 }
 0x270   :  { %v426_v29 = vpop.f32.mrf.mxu2  ;;  %v448_v52 = vadd.f32 0.18741608, %v447_v37 }
 0x271   :  { %v1233_v15 = vadd.f32 %v1181_v43, %v426_v29  ;;  %v496_v18 = vmul.f32 %v495_v14, %v1217_v5  ;;  %v460_v25 = vmul.f32 %v459_v44, %v1197_v54  ;;  %v485_v36 = vmul.f32 %v484_v19, %v1217_v5 }
 0x272   :  { %v449_v63 = vmul.f32 %v448_v52, %v1197_v54 }
 0x273   :  { %v1241_v28 = vmul.f32 0.70710677, %v1233_v15  ;;  %v461_v31 = vadd.f32 1.0, %v460_v25  ;;  %v497_v2 = vadd.f32 0.112945676, %v496_v18 }
 0x274   :  { %v486_v46 = vadd.f32 0.05243302, %v485_v36  ;;  %v450_v20 = vadd.f32 1.1283791, %v449_v63 }
 0x275   :  { %v519_v23 = vmul.f32 %v1241_v28, %v1241_v28  ;;  %837 = vrcp.f32 %v461_v31  ;;  %v498_v0 = vmul.f32 %v497_v2, %v1217_v5  ;;  %vm467_vm4 = vweird.f32 %v461_v31 }
 0x276   :  { %v487_v59 = vmul.f32 %v486_v46, %v1217_v5  ;;  %v473_v8 = vand.u32 2147483648, %v461_v31  ;;  %v471_v32 = vand.u32 2147483647, %v461_v31  ;;  %v451_v2 = vmul.f32 %v450_v20, %v1190_v35 }
 0x277   :  { %v1251_v38 = vmin.f32 %v519_v23, 16.0  ;;  %v499_v45 = vadd.f32 0.4994258, %v498_v0 }
 0x278   :  { %v428_v39 = vpop.f32.mrf.mxu2  ;;  %v488_v7 = vadd.f32 0.18741608, %v487_v59  ;;  %v474_v44 = vor.u32 1.1754944e-38, %v473_v8  ;;  %vm472_vm6 = vcmp.eq.f32.partialorder %v471_v32, 8.507059e+37 }
 0x279   :  { %v1254_v40 = vadd.f32 %v1181_v43, %v428_v39  ;;  %v521_v48 = vmul.f32 2.1237322e-06, %v1251_v38  ;;  %v532_v33 = vmul.f32 3.8918573e-05, %v1251_v38  ;;  %v500_v50 = vmul.f32 %v499_v45, %v1217_v5 }
 0x27a   :  { %v489_v29 = vmul.f32 %v488_v7, %v1217_v5  ;;  %v431_v7 = vmul.f32 0.5, %v1184_v51 }
 0x27b   :  { %v1259_v49 = vmul.f32 0.70710677, %v1254_v40  ;;  %v838_v24 = vpop.eup %837  ;;  %v522_v53 = vadd.f32 0.00028619796, %v521_v48  ;;  %v533_v56 = vadd.f32 0.001143296, %v532_v33 }
 0x27c   :  { %v463_v43 = vmul.f32 %v838_v24, %v461_v31  ;;  %v501_v60 = vadd.f32 1.0, %v500_v50  ;;  %vm468_vm3 = vweird.f32 %v838_v24  ;;  %v490_v23 = vadd.f32 1.1283791, %v489_v29 }
 0x27d   :  { %v559_v57 = vmul.f32 %v1259_v49, %v1259_v49  ;;  %v534_v61 = vmul.f32 %v533_v56, %v1251_v38  ;;  %v523_v3 = vmul.f32 %v522_v53, %v1251_v38  ;;  %vm469_vm5 = vmor %vm467_vm4, %vm468_vm3 }
 0x27e   :  { %v464_v1 = vsub.f32 1.0, %v463_v43  ;;  %839 = vrcp.f32 %v501_v60  ;;  %v513_v0 = vand.u32 2147483648, %v501_v60  ;;  %v511_v46 = vand.u32 2147483647, %v501_v60 }
 0x27f   :  { %v1266_v17 = vmin.f32 %v559_v57, 16.0  ;;  %v535_v55 = vadd.f32 0.014752088, %v534_v61  ;;  %v524_v22 = vadd.f32 0.0036580483, %v523_v3  ;;  %vm507_vm8 = vweird.f32 %v501_v60 }
 0x280   :  { %v465_v6 = vmul.f32 %v838_v24, %v464_v1  ;;  %v514_v35 = vor.u32 1.1754944e-38, %v513_v0  ;;  %v491_v57 = vmul.f32 %v490_v23, %v1208_v62  ;;  %vm512_vm10 = vcmp.eq.f32.partialorder %v511_v46, 8.507059e+37 }
 0x281   :  { %v561_v4 = vmul.f32 2.1237322e-06, %v1266_v17  ;;  %v572_v9 = vmul.f32 3.8918573e-05, %v1266_v17  ;;  %v536_v47 = vmul.f32 %v535_v55, %v1251_v38  ;;  %v525_v21 = vmul.f32 %v524_v22, %v1251_v38 }
 0x282   :  { %v466_v11 = vadd.f32 %v838_v24, %v465_v6 }
 0x283   :  { %v562_v10 = vadd.f32 0.00028619796, %v561_v4  ;;  %v573_v54 = vadd.f32 0.001143296, %v572_v9  ;;  %v537_v13 = vadd.f32 0.112945676, %v536_v47 }
 0x284   :  { %v470_v12 = vsel %vm469_vm5, %v838_v24, %v466_v11  ;;  %v840_v14 = vpop.eup %839  ;;  %v526_v48 = vadd.f32 0.05243302, %v525_v21  ;;  %v432_v9 = vmul.f32 0.5, %v1201_v58 }
 0x285   :  { %v563_v16 = vmul.f32 %v562_v10, %v1266_v17  ;;  %v574_v18 = vmul.f32 %v573_v54, %v1266_v17  ;;  %v503_v19 = vmul.f32 %v840_v14, %v501_v60  ;;  %v475_v25 = vsel %vm472_vm6, %v474_v44, %v470_v12 }
 0x286   :  { %v538_v27 = vmul.f32 %v537_v13, %v1251_v38  ;;  %v476_v39 = vmul.f32 %v475_v25, %v451_v2  ;;  %vm508_vm7 = vweird.f32 %v840_v14  ;;  %v527_v61 = vmul.f32 %v526_v48, %v1251_v38 }
 0x287   :  { %v575_v31 = vadd.f32 0.014752088, %v574_v18  ;;  %v564_v34 = vadd.f32 0.0036580483, %v563_v16  ;;  %v504_v36 = vsub.f32 1.0, %v503_v19  ;;  %vm509_vm9 = vmor %vm507_vm8, %vm508_vm7 }
 0x288   :  { %v539_v37 = vadd.f32 0.4994258, %v538_v27  ;;  %v755_v43 = vclamps-f32 %v476_v39, 1.0  ;;  %v528_v8 = vadd.f32 0.18741608, %v527_v61 }
 0x289   :  { %v576_v5 = vmul.f32 %v575_v31, %v1266_v17  ;;  %v505_v45 = vmul.f32 %v840_v14, %v504_v36  ;;  %v565_v24 = vmul.f32 %v564_v34, %v1266_v17 }
 0x28a   :  { %v540_v33 = vmul.f32 %v539_v37, %v1251_v38  ;;  %v599_v55 = vadd.f32 1.0, %v755_v43  ;;  %v529_v20 = vmul.f32 %v528_v8, %v1251_v38  ;;  %v828_v43 = vld [vmem:[%s1327_s15] ss:$0 sm:$0xff] }
 0x28b   :  { %v577_v50 = vadd.f32 0.112945676, %v576_v5  ;;  %v506_v52 = vadd.f32 %v840_v14, %v505_v45  ;;  %v566_v63 = vadd.f32 0.05243302, %v565_v24  ;;  %v433_v24 = vmul.f32 0.5, %v1233_v15 }
 0x28c   :  { %v541_v53 = vadd.f32 1.0, %v540_v33  ;;  %v603_v47 = vmul.f32 %v599_v55, %v431_v7  ;;  %v530_v58 = vadd.f32 1.1283791, %v529_v20 }
 0x28d   :  { %v578_v56 = vmul.f32 %v577_v50, %v1266_v17  ;;  %v510_v59 = vsel %vm509_vm9, %v840_v14, %v506_v52  ;;  %v567_v62 = vmul.f32 %v566_v63, %v1266_v17  ;;  %v434_v52 = vmul.f32 0.5, %v1254_v40 }
 0x28e   :  { %v515_v1 = vsel %vm512_vm10, %v514_v35, %v510_v59  ;;  %841 = vrcp.f32 %v541_v53  ;;  %v553_v14 = vand.u32 2147483648, %v541_v53  ;;  %v551_v29 = vand.u32 2147483647, %v541_v53 }
 0x28f   :  { %v516_v3 = vmul.f32 %v515_v1, %v491_v57  ;;  %v579_v4 = vadd.f32 0.4994258, %v578_v56  ;;  %v568_v16 = vadd.f32 0.18741608, %v567_v62  ;;  %vm547_vm12 = vweird.f32 %v541_v53 }
 0x290   :  { %v554_v21 = vor.u32 1.1754944e-38, %v553_v14  ;;  %vm552_vm14 = vcmp.eq.f32.partialorder %v551_v29, 8.507059e+37  ;;  %v531_v38 = vmul.f32 %v530_v58, %v1241_v28 }
 0x291   :  { %v756_v6 = vclamps-f32 %v516_v3, 1.0  ;;  %v580_v60 = vmul.f32 %v579_v4, %v1266_v17  ;;  %v569_v18 = vmul.f32 %v568_v16, %v1266_v17 }
 0x293   :  { %v600_v10 = vadd.f32 1.0, %v756_v6  ;;  %v581_v11 = vadd.f32 1.0, %v580_v60  ;;  %v570_v34 = vadd.f32 1.1283791, %v569_v18 }
 0x294   :  { %v842_v32 = vpop.eup %841 }
 0x295   :  { %v604_v22 = vmul.f32 %v600_v10, %v432_v9  ;;  %v543_v54 = vmul.f32 %v842_v32, %v541_v53  ;;  %843 = vrcp.f32 %v581_v11  ;;  %vm548_vm11 = vweird.f32 %v842_v32 }
 0x296   :  { %vm549_vm13 = vmor %vm547_vm12, %vm548_vm11  ;;  %v593_v36 = vand.u32 2147483648, %v581_v11  ;;  %v591_v37 = vand.u32 2147483647, %v581_v11  ;;  %vm587_vm0 = vweird.f32 %v581_v11  ;;  %v571_v39 = vmul.f32 %v570_v34, %v1259_v49  ;;  %v827_v49 = vld [vmem:[%s1326_s14] ss:$0 sm:$0xff]  ;;  %s875_s14 = smov [#allocation2]  }
 0x297   :  { %v607_v12 = vpack.c.bf16 %v604_v22, %v603_v47  ;;  %v544_v13 = vsub.f32 1.0, %v543_v54  ;;  %s716_s15 = sshll.u32 %s875_s14, 4  ;;  %s717_s15 = int_to_ptr.vmem [resolvable:$true] %s716_s15 }
 0x298   :  { %v594_v17 = vor.u32 1.1754944e-38, %v593_v36  ;;  %vm592_vm3 = vcmp.eq.f32.partialorder %v591_v37, 8.507059e+37 }
 0x299   :  { %685 = vmatmul.bf16.vlgmr.msra.gmra.mxu1 %v607_v12  ;;  %v545_v51 = vmul.f32 %v842_v32, %v544_v13 }
 0x29b   :  { %v844_v44 = vpop.eup %843  ;;  %v546_v19 = vadd.f32 %v842_v32, %v545_v51 }
 0x29c   :  { %v583_v25 = vmul.f32 %v844_v44, %v581_v11  ;;  %vm588_vm15 = vweird.f32 %v844_v44 }
 0x29d   :  { %v550_v27 = vsel %vm549_vm13, %v842_v32, %v546_v19  ;;  %vm589_vm1 = vmor %vm587_vm0, %vm588_vm15 }
 0x29e   :  { %v555_v31 = vsel %vm552_vm14, %v554_v21, %v550_v27  ;;  %v584_v2 = vsub.f32 1.0, %v583_v25 }
 0x29f   :  { %v556_v23 = vmul.f32 %v555_v31, %v531_v38 }
 0x2a0   :  { %v585_v0 = vmul.f32 %v844_v44, %v584_v2 }
 0x2a1   :  { %v757_v45 = vclamps-f32 %v556_v23, 1.0 }
 0x2a2   :  { %v586_v5 = vadd.f32 %v844_v44, %v585_v0 }
 0x2a3   :  { %v601_v50 = vadd.f32 1.0, %v757_v45 }
 0x2a4   :  { %v590_v46 = vsel %vm589_vm1, %v844_v44, %v586_v5 }
 0x2a5   :  { %v595_v48 = vsel %vm592_vm3, %v594_v17, %v590_v46  ;;  %v605_v53 = vmul.f32 %v601_v50, %v433_v24 }
 0x2a6   :  { %v596_v33 = vmul.f32 %v595_v48, %v571_v39 }
 0x2a8   :  { %v758_v28 = vclamps-f32 %v596_v33, 1.0 }
 0x2aa   :  { %v602_v35 = vadd.f32 1.0, %v758_v28 }
 0x2ac   :  { %v606_v56 = vmul.f32 %v602_v35, %v434_v52 }
 0x2ae   :  { %v608_v57 = vpack.c.bf16 %v606_v56, %v605_v53 }
 0x2b0   :  { %690 = vmatmul.bf16.vlgmr.msra.gmra.mxu3 %v608_v57 }
 0x316   :  { %v686_v59 = vpop.f32.mrf.mxu1 }
 0x317   :  { %v687_v61 = vadd.f32 %v827_v49, %v686_v59 }
 0x319   :  { %v700_v1 = vmul.f32 %v828_v43, %v687_v61 }
 0x31b   :  { %v704_v15 = vadd.f32 %v700_v1, %v1153_v26 }
 0x31d   :  { %708 = vst.msk [vmem:[#allocation2] sm:$0xff] %vm320_vm2, %v704_v15 }
 0x31e   :  { %v688_v40 = vpop.f32.mrf.mxu1 }
 0x31f   :  { %v689_v63 = vadd.f32 %v827_v49, %v688_v40 }
 0x321   :  { %v701_v3 = vmul.f32 %v828_v43, %v689_v63 }
 0x323   :  { %v705_v4 = vadd.f32 %v701_v3, %v1159_v30 }
 0x325   :  { %709 = vst.msk [vmem:[#allocation2 + $0x8] sm:$0xff] %vm320_vm2, %v705_v4 }
 0x333   :  { %v691_v6 = vpop.f32.mrf.mxu3 }
 0x334   :  { %v692_v55 = vadd.f32 %v827_v49, %v691_v6 }
 0x336   :  { %v702_v60 = vmul.f32 %v828_v43, %v692_v55 }
 0x338   :  { %v706_v7 = vadd.f32 %v702_v60, %v1173_v42 }
 0x33a   :  { %710 = vst.msk [vmem:[#allocation2 + $0x10] sm:$0xff] %vm320_vm2, %v706_v7 }
 0x33b   :  { %v693_v8 = vpop.f32.mrf.mxu3 }
 0x33c   :  { %v694_v9 = vadd.f32 %v827_v49, %v693_v8 }
 0x33e   :  { %v703_v26 = vmul.f32 %v828_v43, %v694_v9 }
 0x340   :  { %v707_v30 = vadd.f32 %v703_v26, %v1171_v41 }
 0x342   :  { %711 = vst.msk [vmem:[#allocation2 + $0x18] sm:$0xff] %vm320_vm2, %v707_v30 }
 0x343   :  { %724 = dma.vmem_to_hbm [thread:$0]  %s717_s15, 512, %s719_s11, [#allocation3], %s876_s22, %s876_s22, %s877_s9  }
 0x344   :  { %869 = dma.done.wait [#allocation3], 512  }
 0x345   :  { %870 = vsyncadd [#allocation3], 4294966784 }
 0x346   :  { %729 = vsyncpa [#allocation3], 1 }

</bundles_post_ra>
